<compile_context>
chip_gen: v7x
topology: tpu7x:2x2x1
jax: 0.10.0
libtpu: 0.0.40
codegen_flags: <defaults>
</compile_context>

<pallas_src>
import jax
import jax.numpy as jnp
import numpy as np
from jax.experimental import pallas as pl
from jax.experimental.pallas import tpu as pltpu

CLAMP_MIN = 0.6  # v1
CLAMP_MAX = 0.9  # v2


def conv1x1_s2_clamp_kernel(x_ref, s_ref, w_ref, b_ref, o_ref):
    # x_ref: (C_in, H*W)      per-batch input, pixels lane-dense (f32)
    # s_ref: (H*W, M)         resident 0/1 sampling matrix, M = H_out*W_out (bf16)
    # w_ref: (C_out, C_in)    resident 1x1 conv weight (f32)
    # b_ref: (C_out, 1)       resident bias column (f32)
    # o_ref: (C_out, M)       final output block
    x_bf = x_ref[...].astype(jnp.bfloat16)
    # Stride-2 sampling + zero border on the MXU. Each output column picks exactly one
    # input pixel (or none, for the conv's zero-padding border) -> exact in f32 accum.
    xs = jnp.dot(x_bf, s_ref[...], preferred_element_type=jnp.float32)      # (C_in, M)
    # Channel mix (the 1x1 conv itself), bf16 operands / f32 accumulate.
    y = jnp.dot(w_ref[...].astype(jnp.bfloat16), xs.astype(jnp.bfloat16),
                preferred_element_type=jnp.float32)                         # (C_out, M)
    y = y + b_ref[...]                 # bias (border columns become exactly bias)
    y = jnp.maximum(y, CLAMP_MIN)      # torch.clamp_min
    y = jnp.minimum(y, CLAMP_MAX)      # torch.clamp_max
    o_ref[...] = y.astype(o_ref.dtype)


def model_forward(x, weight, bias, *, stride=2, padding=1):
    """x: (N, C_in, H, W) NCHW; weight: (C_out, C_in, 1, 1); bias: (C_out,)"""
    N, C_in, H, W = x.shape
    C_out, C_in_w, kh, kw = weight.shape
    assert (C_in_w, kh, kw) == (C_in, 1, 1)

    H_out = (H + 2 * padding - kh) // stride + 1
    W_out = (W + 2 * padding - kw) // stride + 1
    HW = H * W
    M = H_out * W_out

    # --- compile-time constant sampling matrix (numpy => folded into the executable) ---
    # S[p, m] = 1 iff output pixel m samples valid input pixel p; border outputs (which
    # sample the conv's zero padding) get an all-zero column -> bias after the matmuls.
    oh = np.arange(H_out)
    ow = np.arange(W_out)
    ih = oh * stride - padding
    iw = ow * stride - padding
    valid = ((ih >= 0) & (ih < H))[:, None] & ((iw >= 0) & (iw < W))[None, :]
    src = ih[:, None] * W + iw[None, :]          # flat input pixel index
    dst = oh[:, None] * W_out + ow[None, :]      # flat output pixel index
    S_np = np.zeros((HW, M), dtype=np.float32)
    S_np[src[valid], dst[valid]] = 1.0
    S = jnp.asarray(S_np, dtype=jnp.bfloat16)    # 0/1 -> exact in bf16

    # Free (bitcast) reshapes only — no strided slices, no pads, no real copies.
    xm = x.reshape(N, C_in, HW)
    wm = weight.reshape(C_out, C_in)
    bm = bias.reshape(C_out, 1)

    out = pl.pallas_call(
        conv1x1_s2_clamp_kernel,
        out_shape=jax.ShapeDtypeStruct((N, C_out, M), x.dtype),
        grid=(N,),
        in_specs=[
            pl.BlockSpec((None, C_in, HW), lambda n: (n, 0, 0)),   # per-batch input block
            pl.BlockSpec((HW, M), lambda n: (0, 0)),               # resident sampling matrix
            pl.BlockSpec((C_out, C_in), lambda n: (0, 0)),         # resident weight
            pl.BlockSpec((C_out, 1), lambda n: (0, 0)),            # resident bias
        ],
        out_specs=pl.BlockSpec((None, C_out, M), lambda n: (n, 0, 0)),
        compiler_params=pltpu.CompilerParams(
            dimension_semantics=("parallel",)),                    # shard N across cores
    )(xm, S, wm, bm)

    # Contiguous split of the last dim -> bitcast, not a launched op.
    return out.reshape(N, C_out, H_out, W_out)


if __name__ == "__main__":
    key = jax.random.PRNGKey(0)
    kx, kw_, kb = jax.random.split(key, 3)

    # Small shapes consistent with the module (channels fixed at 32 by the conv).
    N, C_in, H, W = 2, 32, 16, 16
    C_out = 32

    x = jax.random.normal(kx, (N, C_in, H, W), dtype=jnp.float32)

    # Deterministic PyTorch-style Conv2d init: U(-1/sqrt(fan_in), 1/sqrt(fan_in))
    fan_in = C_in * 1 * 1
    bound = 1.0 / (fan_in ** 0.5)
    weight = jax.random.uniform(kw_, (C_out, C_in, 1, 1), jnp.float32, -bound, bound)
    bias = jax.random.uniform(kb, (C_out,), jnp.float32, -bound, bound)

    out = jax.block_until_ready(jax.jit(model_forward)(x, weight, bias))

    # expected output spatial size: (16 + 2*1 - 1)//2 + 1 = 9
    H_out = (H + 2 * 1 - 1) // 2 + 1
    assert out.shape == (N, C_out, H_out, H_out), out.shape
    assert bool(jnp.all(out >= CLAMP_MIN)) and bool(jnp.all(out <= CLAMP_MAX))

    # Reference: XLA conv + clamps (same semantics as the PyTorch module).
    ref = jax.lax.conv_general_dilated(
        x, weight, window_strides=(2, 2), padding=((1, 1), (1, 1)),
        dimension_numbers=("NCHW", "OIHW", "NCHW"))
    ref = jnp.clip(ref + bias.reshape(1, C_out, 1, 1), CLAMP_MIN, CLAMP_MAX)
    assert bool(jnp.allclose(out, ref, atol=2e-2, rtol=0.0)), \
        float(jnp.max(jnp.abs(out - ref)))

    print("KERNEL_OK")
</pallas_src>

<mosaic_0001>
module attributes {stable_mosaic.version = 11 : i64} {
  func.func @conv1x1_s2_clamp_kernel(%arg0: i32, %arg1: memref<1x32x256xf32, #tpu.memory_space<vmem>>, %arg2: memref<256x81xbf16, #tpu.memory_space<vmem>>, %arg3: memref<32x32xf32, #tpu.memory_space<vmem>>, %arg4: memref<32x1xf32, #tpu.memory_space<vmem>>, %arg5: memref<1x32x81xf32, #tpu.memory_space<vmem>>) attributes {dimension_semantics = [#tpu.dimension_semantics<parallel>], iteration_bounds = array<i64: 2>, scalar_prefetch = 0 : i64, scratch_operands = 0 : i64, tpu.core_type = #tpu.core_type<tc>, window_params = [{transform_indices = @transform_0, window_bounds = array<i64: 1, 32, 256>}, {pipeline_mode = #tpu.pipeline_mode<synchronous>, transform_indices = @transform_1, window_bounds = array<i64: 256, 81>}, {pipeline_mode = #tpu.pipeline_mode<synchronous>, transform_indices = @transform_2, window_bounds = array<i64: 32, 32>}, {pipeline_mode = #tpu.pipeline_mode<synchronous>, transform_indices = @transform_3, window_bounds = array<i64: 32, 1>}, {transform_indices = @transform_4, window_bounds = array<i64: 1, 32, 81>}]} {
    %c0 = arith.constant 0 : index
    %c0_0 = arith.constant 0 : index
    %c0_1 = arith.constant 0 : index
    %0 = vector.load %arg1[%c0, %c0_0, %c0_1] : memref<1x32x256xf32, #tpu.memory_space<vmem>>, vector<1x32x256xf32>
    %1 = vector.shape_cast %0 : vector<1x32x256xf32> to vector<32x256xf32>
    %2 = arith.truncf %1 : vector<32x256xf32> to vector<32x256xbf16>
    %c0_2 = arith.constant 0 : index
    %c0_3 = arith.constant 0 : index
    %3 = vector.load %arg2[%c0_2, %c0_3] : memref<256x81xbf16, #tpu.memory_space<vmem>>, vector<256x81xbf16>
    %cst = arith.constant dense<0.000000e+00> : vector<32x81xf32>
    %4 = tpu.matmul %2, %3, %cst {dimension_numbers = #tpu.dot_dimension_numbers<[1], [0], [0], [1], [0, 0, 1, 1], [], []>} : vector<32x256xbf16>, vector<256x81xbf16>, vector<32x81xf32> -> vector<32x81xf32>
    %c0_4 = arith.constant 0 : index
    %c0_5 = arith.constant 0 : index
    %5 = vector.load %arg3[%c0_4, %c0_5] : memref<32x32xf32, #tpu.memory_space<vmem>>, vector<32x32xf32>
    %6 = arith.truncf %5 : vector<32x32xf32> to vector<32x32xbf16>
    %7 = arith.truncf %4 : vector<32x81xf32> to vector<32x81xbf16>
    %cst_6 = arith.constant dense<0.000000e+00> : vector<32x81xf32>
    %8 = tpu.matmul %6, %7, %cst_6 {dimension_numbers = #tpu.dot_dimension_numbers<[1], [0], [0], [1], [0, 0, 1, 1], [], []>} : vector<32x32xbf16>, vector<32x81xbf16>, vector<32x81xf32> -> vector<32x81xf32>
    %c0_7 = arith.constant 0 : index
    %c0_8 = arith.constant 0 : index
    %9 = vector.load %arg4[%c0_7, %c0_8] : memref<32x1xf32, #tpu.memory_space<vmem>>, vector<32x1xf32>
    %10 = vector.broadcast %9 : vector<32x1xf32> to vector<32x81xf32>
    %11 = arith.addf %8, %10 : vector<32x81xf32>
    %cst_9 = arith.constant 6.000000e-01 : f32
    %12 = vector.broadcast %cst_9 : f32 to vector<32x81xf32>
    %13 = arith.maximumf %11, %12 : vector<32x81xf32>
    %cst_10 = arith.constant 0.899999976 : f32
    %14 = vector.broadcast %cst_10 : f32 to vector<32x81xf32>
    %15 = arith.minimumf %13, %14 : vector<32x81xf32>
    %c0_11 = arith.constant 0 : index
    %c0_12 = arith.constant 0 : index
    %c0_13 = arith.constant 0 : index
    %16 = vector.load %arg5[%c0_11, %c0_12, %c0_13] : memref<1x32x81xf32, #tpu.memory_space<vmem>>, vector<1x32x81xf32>
    %17 = vector.shape_cast %16 : vector<1x32x81xf32> to vector<32x81xf32>
    %18 = vector.shape_cast %15 : vector<32x81xf32> to vector<1x32x81xf32>
    tpu.vector_store %arg5[%c0_11, %c0_12, %c0_13], %18 {strides = array<i32>} : memref<1x32x81xf32, #tpu.memory_space<vmem>>, vector<1x32x81xf32>,
    return
  }
  func.func @transform_0(%arg0: i32) -> (i32, i32, i32) {
    %c0_i32 = arith.constant 0 : i32
    %c0_i32_0 = arith.constant 0 : i32
    %c0_i32_1 = arith.constant 0 : i32
    return %arg0, %c0_i32, %c0_i32_0 : i32, i32, i32
  }
  func.func @transform_1(%arg0: i32) -> (i32, i32) {
    %c0_i32 = arith.constant 0 : i32
    %c0_i32_0 = arith.constant 0 : i32
    %c0_i32_1 = arith.constant 0 : i32
    return %c0_i32, %c0_i32_0 : i32, i32
  }
  func.func @transform_2(%arg0: i32) -> (i32, i32) {
    %c0_i32 = arith.constant 0 : i32
    %c0_i32_0 = arith.constant 0 : i32
    %c0_i32_1 = arith.constant 0 : i32
    return %c0_i32, %c0_i32_0 : i32, i32
  }
  func.func @transform_3(%arg0: i32) -> (i32, i32) {
    %c0_i32 = arith.constant 0 : i32
    %c0_i32_0 = arith.constant 0 : i32
    %c0_i32_1 = arith.constant 0 : i32
    return %c0_i32, %c0_i32_0 : i32, i32
  }
  func.func @transform_4(%arg0: i32) -> (i32, i32, i32) {
    %c0_i32 = arith.constant 0 : i32
    %c0_i32_0 = arith.constant 0 : i32
    %c0_i32_1 = arith.constant 0 : i32
    return %arg0, %c0_i32, %c0_i32_0 : i32, i32, i32
  }
}

</mosaic_0001>

<bundles_post_ra>
// kernel: model_forward.1
= control target key start
LH: loop header
LB: loop body
LE: loop exit
PB: predicated region body
PF: predicated region fallthrough
CT: control target
= control target key end

     0   :  { %s676_s15 = smov 0   ;;  %s771_s0 = inlined_call_operand.vmem [shape: f32[2,32,256], index: 0, kind: input, shape index: {}]   ;;  %s772_s1 = inlined_call_operand.vmem [shape: bf16[256,81], index: 1, kind: input, shape index: {}]   ;;  %s773_s2 = inlined_call_operand.vmem [shape: f32[32,32], index: 2, kind: input, shape index: {}]   ;;  %s774_s3 = inlined_call_operand.vmem [shape: f32[32,1], index: 3, kind: input, shape index: {}]   ;;  %s775_s4 = inlined_call_operand.vmem [shape: f32[2,32,81], index: 4, kind: output, shape index: {}]  }
   0x1 LB: > { %s544_s16 = sadd.s32 4294967295, %s648_s15   ;;  %p548_p0 = scmp.ge.s32.totalorder %s648_s15, 1  ;;  %s648_s15 = sphi %s676_s15, %s14_s15  }
   0x2   : > { %p162_p1 = scmp.lt.s32.totalorder %s648_s15, 3 }
   0x4   : > { %p163_p2 = pnand %p548_p0, %p162_p1 }
   0x5   : > { %v626_v0 = vld [vmem:[%s772_s1 + $0x40] sm:$0xff] (!%p163_p2)   ;;  %v628_v2 = vld [vmem:[%s772_s1 + $0x48] sm:$0xff] (!%p163_p2)   ;;  %p188_p3 = scmp.lt.s32.totalorder (!%p163_p2), %s544_s16, 1  ;;  %v630_v4 = vld [vmem:[%s772_s1 + $0x50] sm:$0xff] (!%p163_p2)   ;;  %vm420_vm0 = vcmask (!%p163_p2), 261120   ;;  %v650_v33 = vmov (!%p163_p2), 0  }
   0x6   : > { %166 = sbr.rel (%p163_p2) target bundleno = 491 (0x1eb), region = 36  ;;  %v627_v1 = vld [vmem:[%s772_s1] sm:$0xff] (!%p163_p2)   ;;  %575 = vmatprep.subr.bf16.mxu0 (!%p163_p2), %v626_v0  ;;  %v629_v3 = vld [vmem:[%s772_s1 + $0x8] sm:$0xff] (!%p163_p2)   ;;  %v631_v5 = vld [vmem:[%s772_s1 + $0x10] sm:$0xff] (!%p163_p2)   ;;  %625 = vset.pattern.permute.xlu1 (!%p163_p2), %v650_v33  ;;  %vm484_vm1 = vcmask (!%p163_p2), 662528  }
   0x7   : > { %576 = vmatpush3.bf16.msra.mxu0 (!%p163_p2), %v627_v1  ;;  %v632_v6 = vld [vmem:[%s772_s1 + $0x58] sm:$0xff] (!%p163_p2)   ;;  %v634_v8 = vld [vmem:[%s772_s1 + $0x60] sm:$0xff] (!%p163_p2)   ;;  %v636_v10 = vld [vmem:[%s772_s1 + $0x68] sm:$0xff] (!%p163_p2)   ;;  %624 = vset.pattern.permute.xlu0 (!%p163_p2), %v650_v33 }
   0x8   : > { %577 = vmatprep.subr.bf16.mxu0 (!%p163_p2), %v628_v2  ;;  %v633_v7 = vld [vmem:[%s772_s1 + $0x18] sm:$0xff] (!%p163_p2)   ;;  %v635_v9 = vld [vmem:[%s772_s1 + $0x20] sm:$0xff] (!%p163_p2)   ;;  %v637_v14 = vld [vmem:[%s772_s1 + $0x28] sm:$0xff] (!%p163_p2)  }
   0x9   : > { %v638_v15 = vld [vmem:[%s772_s1 + $0x70] sm:$0xff] (!%p163_p2)   ;;  %v640_v17 = vld [vmem:[%s772_s1 + $0x78] sm:$0xff] (!%p163_p2)   ;;  %v388_v28 = vld [vmem:[%s773_s2] sm:$0xff] (!%p163_p2) }
   0xa   : > { %v639_v16 = vld [vmem:[%s772_s1 + $0x30] sm:$0xff] (!%p163_p2)   ;;  %v641_v18 = vld [vmem:[%s772_s1 + $0x38] sm:$0xff] (!%p163_p2)   ;;  %v389_v29 = vld [vmem:[%s773_s2 + $0x8] sm:$0xff] (!%p163_p2) }
   0xb   : > { %578 = vmatpush3.bf16.msra.mxu0 (!%p163_p2), %v629_v3  ;;  %v392_v30 = vpack.c.bf16 (!%p163_p2), %v389_v29, %v388_v28  ;;  %v398_v31 = vld [vmem:[%s774_s3 + $0x10] sm:$0xff] (!%p163_p2)  ;;  %v396_v32 = vld [vmem:[%s774_s3] sm:$0xff] (!%p163_p2)  ;;  %v399_v34 = vld [vmem:[%s774_s3 + $0x18] sm:$0xff] (!%p163_p2) }
   0xc   : > { %579 = vmatprep.subr.bf16.mxu0 (!%p163_p2), %v630_v4  ;;  %412 = vperm.xlu1 (!%p163_p2), %625, %v398_v31   ;;  %v397_v35 = vld [vmem:[%s774_s3 + $0x8] sm:$0xff] (!%p163_p2)  ;;  %v390_v49 = vld [vmem:[%s773_s2 + $0x10] sm:$0xff] (!%p163_p2)  ;;  %v391_v50 = vld [vmem:[%s773_s2 + $0x18] sm:$0xff] (!%p163_p2) }
   0xd   : > { %s777_s16 = smov (!%p188_p3, %s544_s16), 1  ;;  %611 = vmatprep.mubr.msk.bf16.mxu1 %vm420_vm0, %v392_v30  ;;  %402 = vperm.xlu0 %624, %v396_v32   ;;  %v393_v52 = vpack.c.bf16 %v391_v50, %v390_v49 }
   0xe   : > { %s573_s5 = sshll.u32 %s777_s16, 6  ;;  %s574_s21 = sshll.u32 %s777_s16, 5 }
   0xf   : > { %580 = vmatpush3.bf16.msra.mxu0 %v631_v5  ;;  %s192_s12 = scalar_lea.vmem %s771_s0, %s573_s5  ;;  %s197_s24 = scalar_lea.vmem %s775_s4, %s574_s21 }
  0x10   : > { %581 = vmatprep.subr.bf16.mxu0 %v632_v6  ;;  %v200_v11 = vld [vmem:[%s192_s12 + $0x8] sm:$0xff]  ;;  %v202_v12 = vld [vmem:[%s192_s12 + $0x18] sm:$0xff]  ;;  %v199_v19 = vld [vmem:[%s192_s12] sm:$0xff]  ;;  %417 = vperm.xlu1 %625, %v399_v34  }
  0x11   : > { %v208_v13 = vpack.c.bf16 %v202_v12, %v200_v11  ;;  %v201_v20 = vld [vmem:[%s192_s12 + $0x10] sm:$0xff]  ;;  %v204_v21 = vld [vmem:[%s192_s12 + $0x28] sm:$0xff]  ;;  %v206_v22 = vld [vmem:[%s192_s12 + $0x38] sm:$0xff]  ;;  %407 = vperm.xlu0 %624, %v397_v35  }
  0x12   : > { %v207_v23 = vpack.c.bf16 %v201_v20, %v199_v19  ;;  %v210_v24 = vpack.c.bf16 %v206_v22, %v204_v21  ;;  %v203_v25 = vld [vmem:[%s192_s12 + $0x20] sm:$0xff]  ;;  %v205_v26 = vld [vmem:[%s192_s12 + $0x30] sm:$0xff] }
  0x13   : > { %582 = vmatpush3.bf16.msra.mxu0 %v633_v7  ;;  %371 = vmatprep.mubr.bf16.mxu0 %v208_v13  ;;  %v209_v27 = vpack.c.bf16 %v205_v26, %v203_v25 }
  0x14   : > { %583 = vmatprep.subr.bf16.mxu0 %v634_v8 }
  0x17   : > { %584 = vmatpush3.bf16.msra.mxu0 %v635_v9 }
  0x18   : > { %585 = vmatprep.subr.bf16.mxu0 %v636_v10 }
  0x1b   : > { %586 = vmatpush3.bf16.msra.mxu0 %v637_v14 }
  0x1c   : > { %587 = vmatprep.subr.bf16.mxu0 %v638_v15 }
  0x1f   : > { %588 = vmatpush3.bf16.msra.mxu0 %v639_v16 }
  0x20   : > { %589 = vmatprep.subr.bf16.mxu0 %v640_v17 }
  0x23   : > { %590 = vmatpush3.bf16.msra.mxu0 %v641_v18 }
  0x26   : > { %372 = vmatmul.mubr.bf16.vlgmr.msra.gmra.mrb[0].mxu0 %v207_v23 }
  0x27   : > { %379 = vmatprep.mubr.bf16.mxu0 %v210_v24 }
  0x2e   : > { %380 = vmatmul.mubr.bf16.gmra.mrb[4].mxu0 %v209_v27 }
  0x8b   : > { %v413_v53 = vpop.permute.xlu1 %412 }
  0x8c   : > { %v403_v54 = vpop.permute.xlu0 %402 }
  0x8f   : > { %v418_v58 = vpop.permute.xlu1 %417 }
  0x90   : > { %v408_v61 = vpop.permute.xlu0 %407 }
  0xf9   : > { %v591_v36 = vpop.f32.mrb[0].mxu0 }
  0xfa   : > { %v592_v37 = vpop.f32.mrb[1].mxu0 }
  0xfb   : > { %v593_v38 = vadd.f32 %v592_v37, %v591_v36  ;;  %v594_v39 = vpop.f32.mrb[2].mxu0 }
  0xfc   : > { %v595_v40 = vpop.f32.mrb[3].mxu0 }
  0xfd   : > { %v596_v41 = vadd.f32 %v595_v40, %v594_v39 }
  0xff   : > { %v394_v42 = vpack.c.bf16 %v596_v41, %v593_v38 }
 0x101   : > { %v597_v43 = vpop.f32.mrb[4].mxu0  ;;  %607 = vmatprep.subr.bf16.mxu1 %v394_v42 }
 0x102   : > { %v598_v44 = vpop.f32.mrb[5].mxu0  ;;  %608 = vmatpush3.bf16.msra.mxu1 %v394_v42 }
 0x103   : > { %v599_v45 = vadd.f32 %v598_v44, %v597_v43  ;;  %v600_v46 = vpop.f32.mrb[6].mxu0 }
 0x104   : > { %v601_v47 = vpop.f32.mrb[7].mxu0 }
 0x105   : > { %v602_v48 = vadd.f32 %v601_v47, %v600_v46 }
 0x107   : > { %v395_v51 = vpack.c.bf16 %v602_v48, %v599_v45 }
 0x109   : > { %609 = vmatprep.subr.bf16.mxu1 %v395_v51 }
 0x10a   : > { %610 = vmatpush3.bf16.msra.mxu1 %v395_v51 }
 0x10d   : > { %612 = vmatmul.mubr.msk.bf16.vlgmr.msra.gmra.mrb[0].mxu1 %vm420_vm0, %v393_v52 }
 0x1e0   : > { %v613_v55 = vpop.f32.mrb[0].mxu1 }
 0x1e1   : > { %v470_v56 = vadd.f32 %v613_v55, %v413_v53  ;;  %v461_v57 = vpop.f32.mrb[1].mxu1 }
 0x1e2   : > { %v462_v59 = vadd.f32 %v461_v57, %v403_v54  ;;  %v614_v60 = vpop.f32.mrb[2].mxu1 }
 0x1e3   : > { %v478_v62 = vmax.f32 %v470_v56, 0.6  ;;  %v473_v63 = vadd.f32 %v614_v60, %v418_v58  ;;  %v464_v0 = vpop.f32.mrb[3].mxu1 }
 0x1e4   : > { %v476_v1 = vmax.f32 %v462_v59, 0.6  ;;  %v465_v2 = vadd.f32 %v464_v0, %v408_v61 }
 0x1e5   : > { %v482_v3 = vmin.f32 %v478_v62, 0.9  ;;  %v479_v4 = vmax.f32 %v473_v63, 0.6 }
 0x1e6   : > { %v480_v5 = vmin.f32 %v476_v1, 0.9  ;;  %v477_v6 = vmax.f32 %v465_v2, 0.6 }
 0x1e7   : > { %487 = vst.msk [vmem:[%s197_s24 + $0x10] sm:$0xff] %vm484_vm1, %v482_v3  ;;  %v483_v7 = vmin.f32 %v479_v4, 0.9 }
 0x1e8   : > { %485 = vst.msk [vmem:[%s197_s24] sm:$0xff] %vm484_vm1, %v480_v5  ;;  %v481_v8 = vmin.f32 %v477_v6, 0.9 }
 0x1e9   : > { %488 = vst.msk [vmem:[%s197_s24 + $0x18] sm:$0xff] %vm484_vm1, %v483_v7 }
 0x1ea   : > { %486 = vst.msk [vmem:[%s197_s24 + $0x8] sm:$0xff] %vm484_vm1, %v481_v8 }
 0x1eb PF: > { %s14_s15 = sadd.s32 1, %s648_s15  }
 0x1ec   : > { %p11_p4 = scmp.ge.s32.totalorder %s14_s15, 4  }
 0x1ee   :  { %13 = sbr.rel (!%p11_p4) target bundleno = 1 (0x1), region = 66 }

</bundles_post_ra>
